<compile_context>
chip_gen: v7x
topology: tpu7x:2x2x1
jax: 0.10.0
libtpu: 0.0.40
codegen_flags: <defaults>
</compile_context>

<pallas_src>
import functools

import jax
import jax.numpy as jnp
from jax.experimental import pallas as pl
from jax.experimental.pallas import tpu as pltpu

_LANES = 128
_SUBLANES = 8
_DEFAULT_TILE_BYTES = 1 << 20                 # ~1 MiB per streamed buffer (two-pass path)
_FUSED_VMEM_BUDGET_BYTES = 20 * 1024 * 1024   # conservative gate for the fused path
_VMEM_LIMIT_BYTES = 32 * 1024 * 1024


# ---------------------------------------------------------------------------
# Small in-kernel helpers (all shapes static; compiled per block shape).
# ---------------------------------------------------------------------------

def _partial_8x128(v):
    """(rows, 128) f32 -> (8, 128) partial sums using plain vreg adds when rows
    is a multiple of 8 (no XLU work per tile)."""
    rows = v.shape[0]
    if rows % _SUBLANES == 0:
        return jnp.sum(v.reshape(rows // _SUBLANES, _SUBLANES, _LANES), axis=0)
    s = jnp.sum(v, axis=0, keepdims=True)                       # (1, 128)
    return jnp.concatenate([s, jnp.zeros((_SUBLANES - 1, _LANES), jnp.float32)], axis=0)


def _collapse(part):
    """(k, 128) f32 -> (1, 1) total (one small XLU collapse)."""
    s = jnp.sum(part, axis=0, keepdims=True)                    # (1, 128)
    return jnp.sum(s, axis=1, keepdims=True)                    # (1, 1)


# ---------------------------------------------------------------------------
# Fused single-pass kernel: whole sample resident, x read once, w/b resident.
# ---------------------------------------------------------------------------

def _fused_kernel(x_ref, w_ref, b_ref, o_ref, *, inv_d, eps):
    # x_ref/o_ref: (1, R, 128) one full sample; w_ref/b_ref: (R, 128), constant
    # block index => DMA'd once and kept resident across the whole grid.
    x = x_ref[0].astype(jnp.float32)                            # (R, 128)
    mean = _collapse(_partial_8x128(x)) * inv_d                 # (1, 1)
    xc = x - mean
    var = _collapse(_partial_8x128(xc * xc)) * inv_d            # (1, 1), mean-subtracted
    rstd = jax.lax.rsqrt(var + eps)                             # EUP
    w = w_ref[...].astype(jnp.float32)
    b = b_ref[...].astype(jnp.float32)
    o_ref[0] = (xc * rstd * w + b).astype(o_ref.dtype)


# ---------------------------------------------------------------------------
# Two-pass fallback (samples too large to keep resident in VMEM).
# ---------------------------------------------------------------------------

def _stats_kernel(x_ref, stats_ref, acc_ref, *, inv_d, eps):
    # x_ref:     (1, tile_r, 128) tile of one sample (reduction axis = grid dim 1)
    # stats_ref: (1, 8, 128) per-sample output block, resident across the
    #            reduction axis; row 0 = mean, row 1 = rstd after finalize.
    # acc_ref:   (2, 8, 128) VMEM scratch (running sum / sum-of-squares).
    r = pl.program_id(1)

    @pl.when(r == 0)
    def _init():
        acc_ref[...] = jnp.zeros_like(acc_ref)
        stats_ref[...] = jnp.zeros_like(stats_ref)

    x = x_ref[0].astype(jnp.float32)                            # (tile_r, 128)
    acc_ref[0] += _partial_8x128(x)                             # full-vreg adds only
    acc_ref[1] += _partial_8x128(x * x)

    @pl.when(r == pl.num_programs(1) - 1)
    def _finalize():
        total = _collapse(acc_ref[0])                           # (1, 1)
        total_sq = _collapse(acc_ref[1])
        mean = total * inv_d
        # TODO(synk): shifted/compensated accumulation to guard E[x^2]-mean^2
        # against cancellation for large-offset inputs (fallback path only;
        # the fused path already uses the mean-subtracted formulation).
        var = jnp.maximum(total_sq * inv_d - mean * mean, 0.0)
        rstd = jax.lax.rsqrt(var + eps)                         # EUP
        stats_ref[0, 0:1, :] = jnp.broadcast_to(mean, (1, _LANES))
        stats_ref[0, 1:2, :] = jnp.broadcast_to(rstd, (1, _LANES))


def _apply_kernel(x_ref, stats_ref, w_ref, b_ref, o_ref):
    # Fully parallel: y = (x - mean) * rstd * w + b, one unmasked store per tile.
    x = x_ref[0].astype(jnp.float32)                            # (tile_r, 128)
    mean = stats_ref[0, 0:1, :]                                 # (1, 128)
    rstd = stats_ref[0, 1:2, :]                                 # (1, 128)
    w = w_ref[...].astype(jnp.float32)
    b = b_ref[...].astype(jnp.float32)
    o_ref[0] = ((x - mean) * rstd * w + b).astype(o_ref.dtype)


# ---------------------------------------------------------------------------
# Wrapper / tiling heuristics.
# ---------------------------------------------------------------------------

def _fused_vmem_estimate(d, x_itemsize, wb_itemsize):
    # x in + out (double-buffered) + w + b (assume double-buffered) + ~4 f32
    # sized in-kernel temporaries (x_f32 / xc / squares / y) of headroom.
    return d * (4 * x_itemsize + 4 * wb_itemsize + 16)


def _pick_tile_rows(num_rows, itemsize, max_tile_bytes):
    """Largest divisor of num_rows giving a lane-dense (rows, 128) tile that
    respects the dtype's sublane-packing multiple and stays <= max_tile_bytes
    per buffer. Falls back to the full extent (always BlockSpec-legal)."""
    sub = max(_SUBLANES, 32 // max(1, itemsize))   # f32 -> 8, bf16 -> 16, int8 -> 32
    cap = max(1, max_tile_bytes // (_LANES * itemsize))
    cap = min(cap, num_rows)
    best_8aligned = None
    for cand in range(cap, 0, -1):
        if num_rows % cand:
            continue
        if cand % sub == 0:
            return cand                            # largest dtype-aligned divisor <= cap
        if best_8aligned is None and cand % _SUBLANES == 0:
            best_8aligned = cand
    if best_8aligned is not None:
        return best_8aligned
    # TODO(synk): cdiv grid + masked tail tile for row counts with no usable divisor.
    return num_rows


def layer_norm_2d(x, weight, bias, eps=1e-5, *, use_fused=None,
                  max_tile_bytes=_DEFAULT_TILE_BYTES):
    """x: (N, C, H, W); weight, bias: (C, H, W). Returns same shape/dtype as x."""
    N, C, H, W = x.shape
    assert weight.shape == (C, H, W) and bias.shape == (C, H, W)
    D = C * H * W
    # TODO(synk): support C*H*W not divisible by 128 (needs a masked tail tile).
    assert D % _LANES == 0, "C*H*W must be a multiple of 128"
    R = D // _LANES

    x2 = x.reshape(N, R, _LANES)
    w2 = weight.reshape(R, _LANES)      # native dtype; cast inside the kernel
    b2 = bias.reshape(R, _LANES)

    if use_fused is None:
        use_fused = _fused_vmem_estimate(
            D, x.dtype.itemsize, weight.dtype.itemsize) <= _FUSED_VMEM_BUDGET_BYTES

    if use_fused:
        # Single pass: one HBM read + one write of x; w/b fetched once (constant
        # block index -> DMA elided on subsequent grid steps).
        # TODO(synk): when N == 1 on v7x, one TensorCore idles; could split R
        # across cores with per-core partial sums.
        y2 = pl.pallas_call(
            functools.partial(_fused_kernel, inv_d=1.0 / D, eps=float(eps)),
            out_shape=jax.ShapeDtypeStruct((N, R, _LANES), x.dtype),
            grid_spec=pltpu.PrefetchScalarGridSpec(
                num_scalar_prefetch=0,
                grid=(N,),
                in_specs=[
                    pl.BlockSpec((1, R, _LANES), lambda n: (n, 0, 0)),
                    pl.BlockSpec((R, _LANES), lambda n: (0, 0)),
                    pl.BlockSpec((R, _LANES), lambda n: (0, 0)),
                ],
                out_specs=pl.BlockSpec((1, R, _LANES), lambda n: (n, 0, 0)),
            ),
            compiler_params=pltpu.CompilerParams(
                dimension_semantics=("parallel",),
                vmem_limit_bytes=_VMEM_LIMIT_BYTES,
            ),
        )(x2, w2, b2)
        return y2.reshape(N, C, H, W)

    # ---------------- Two-pass fallback (oversized samples) ----------------
    tile_r = _pick_tile_rows(R, x.dtype.itemsize, max_tile_bytes)
    num_r_tiles = R // tile_r

    # Pass 1: per-sample mean / rstd (tiny (N, 8, 128) f32 stats).
    stats = pl.pallas_call(
        functools.partial(_stats_kernel, inv_d=1.0 / D, eps=float(eps)),
        out_shape=jax.ShapeDtypeStruct((N, _SUBLANES, _LANES), jnp.float32),
        grid_spec=pltpu.PrefetchScalarGridSpec(
            num_scalar_prefetch=0,
            grid=(N, num_r_tiles),                     # reduction axis last
            in_specs=[
                pl.BlockSpec((1, tile_r, _LANES), lambda n, r: (n, r, 0)),
            ],
            out_specs=pl.BlockSpec((1, _SUBLANES, _LANES), lambda n, r: (n, 0, 0)),
            scratch_shapes=[pltpu.VMEM((2, _SUBLANES, _LANES), jnp.float32)],
        ),
        compiler_params=pltpu.CompilerParams(
            dimension_semantics=("parallel", "arbitrary"),
            vmem_limit_bytes=_VMEM_LIMIT_BYTES,
        ),
    )(x2)

    # Pass 2: normalize + affine. Grid is (r, n) with n innermost so the w/b
    # block index is unchanged across consecutive steps -> their DMA is elided
    # and w/b are read from HBM only once per r-tile (not once per sample).
    y2 = pl.pallas_call(
        _apply_kernel,
        out_shape=jax.ShapeDtypeStruct((N, R, _LANES), x.dtype),
        grid_spec=pltpu.PrefetchScalarGridSpec(
            num_scalar_prefetch=0,
            grid=(num_r_tiles, N),
            in_specs=[
                pl.BlockSpec((1, tile_r, _LANES), lambda r, n: (n, r, 0)),
                pl.BlockSpec((1, _SUBLANES, _LANES), lambda r, n: (n, 0, 0)),
                pl.BlockSpec((tile_r, _LANES), lambda r, n: (r, 0)),
                pl.BlockSpec((tile_r, _LANES), lambda r, n: (r, 0)),
            ],
            out_specs=pl.BlockSpec((1, tile_r, _LANES), lambda r, n: (n, r, 0)),
        ),
        compiler_params=pltpu.CompilerParams(
            dimension_semantics=("parallel", "parallel"),
            vmem_limit_bytes=_VMEM_LIMIT_BYTES,
        ),
    )(x2, stats, w2, b2)

    return y2.reshape(N, C, H, W)


def layer_norm_2d_ref(x, weight, bias, eps=1e-5):
    # Pure-JAX reference mirroring torch.nn.functional.layer_norm over dims (1,2,3).
    xf = x.astype(jnp.float32)
    mean = jnp.mean(xf, axis=(1, 2, 3), keepdims=True)
    var = jnp.mean((xf - mean) ** 2, axis=(1, 2, 3), keepdims=True)
    y = (xf - mean) / jnp.sqrt(var + eps)
    return (y * weight[None] + bias[None]).astype(x.dtype)


if __name__ == "__main__":
    # Test 1: shapes/init matching LayerNorm2d (weight=ones, bias=zeros).
    key = jax.random.PRNGKey(0)
    N, C, H, W = 2, 4, 16, 16
    x = jax.random.normal(key, (N, C, H, W), dtype=jnp.float32)
    weight = jnp.ones((C, H, W), dtype=jnp.float32)
    bias = jnp.zeros((C, H, W), dtype=jnp.float32)

    out = jax.block_until_ready(layer_norm_2d(x, weight, bias, eps=1e-5))
    ref = layer_norm_2d_ref(x, weight, bias, eps=1e-5)
    assert out.shape == x.shape and out.dtype == x.dtype
    assert jnp.allclose(out, ref, atol=1e-4, rtol=1e-4), "fused path mismatch vs reference"

    # Test 2: non-trivial affine, exercised on both the fused path and the
    # two-pass fallback (fallback forced with a tiny tile cap -> >= 2 r-tiles).
    kx, kw, kb = jax.random.split(jax.random.PRNGKey(0), 3)
    x2 = jax.random.normal(kx, (2, 8, 16, 16), dtype=jnp.float32) * 1.7 + 0.3
    w2 = 1.0 + 0.1 * jax.random.normal(kw, (8, 16, 16), dtype=jnp.float32)
    b2 = 0.1 * jax.random.normal(kb, (8, 16, 16), dtype=jnp.float32)
    ref2 = layer_norm_2d_ref(x2, w2, b2, eps=1e-5)

    out_fused = jax.block_until_ready(
        layer_norm_2d(x2, w2, b2, eps=1e-5, use_fused=True))
    out_2pass = jax.block_until_ready(
        layer_norm_2d(x2, w2, b2, eps=1e-5, use_fused=False, max_tile_bytes=4096))
    assert jnp.allclose(out_fused, ref2, atol=1e-4, rtol=1e-4), "fused affine mismatch"
    assert jnp.allclose(out_2pass, ref2, atol=1e-4, rtol=1e-4), "two-pass fallback mismatch"

    print("KERNEL_OK")
</pallas_src>

<mosaic_0001>
module attributes {stable_mosaic.version = 11 : i64} {
  func.func @_fused_kernel(%arg0: i32, %arg1: memref<1x8x128xf32, #tpu.memory_space<vmem>>, %arg2: memref<8x128xf32, #tpu.memory_space<vmem>>, %arg3: memref<8x128xf32, #tpu.memory_space<vmem>>, %arg4: memref<1x8x128xf32, #tpu.memory_space<vmem>>) attributes {dimension_semantics = [#tpu.dimension_semantics<parallel>], iteration_bounds = array<i64: 2>, scalar_prefetch = 0 : i64, scratch_operands = 0 : i64, tpu.core_type = #tpu.core_type<tc>, window_params = [{transform_indices = @transform_0, window_bounds = array<i64: 1, 8, 128>}, {pipeline_mode = #tpu.pipeline_mode<synchronous>, transform_indices = @transform_1, window_bounds = array<i64: 8, 128>}, {pipeline_mode = #tpu.pipeline_mode<synchronous>, transform_indices = @transform_2, window_bounds = array<i64: 8, 128>}, {transform_indices = @transform_3, window_bounds = array<i64: 1, 8, 128>}]} {
    %c0 = arith.constant 0 : index
    %c0_0 = arith.constant 0 : index
    %c0_1 = arith.constant 0 : index
    %0 = vector.load %arg1[%c0, %c0_0, %c0_1] : memref<1x8x128xf32, #tpu.memory_space<vmem>>, vector<1x8x128xf32>
    %1 = vector.shape_cast %0 : vector<1x8x128xf32> to vector<8x128xf32>
    %2 = vector.shape_cast %1 : vector<8x128xf32> to vector<1x8x128xf32>
    %cst = arith.constant dense<0.000000e+00> : vector<8x128xf32>
    %3 = vector.multi_reduction <add>, %2, %cst [0] : vector<1x8x128xf32> to vector<8x128xf32>
    %cst_2 = arith.constant dense<0.000000e+00> : vector<128xf32>
    %4 = vector.multi_reduction <add>, %3, %cst_2 [0] : vector<8x128xf32> to vector<128xf32>
    %5 = vector.shape_cast %4 : vector<128xf32> to vector<1x128xf32>
    %cst_3 = arith.constant dense<0.000000e+00> : vector<1xf32>
    %6 = vector.multi_reduction <add>, %5, %cst_3 [1] : vector<1x128xf32> to vector<1xf32>
    %7 = vector.shape_cast %6 : vector<1xf32> to vector<1x1xf32>
    %cst_4 = arith.constant 9.765625E-4 : f32
    %8 = vector.broadcast %cst_4 : f32 to vector<1x1xf32>
    %9 = arith.mulf %7, %8 : vector<1x1xf32>
    %10 = vector.broadcast %9 : vector<1x1xf32> to vector<8x128xf32>
    %11 = arith.subf %1, %10 : vector<8x128xf32>
    %12 = arith.mulf %11, %11 : vector<8x128xf32>
    %13 = vector.shape_cast %12 : vector<8x128xf32> to vector<1x8x128xf32>
    %cst_5 = arith.constant dense<0.000000e+00> : vector<8x128xf32>
    %14 = vector.multi_reduction <add>, %13, %cst_5 [0] : vector<1x8x128xf32> to vector<8x128xf32>
    %cst_6 = arith.constant dense<0.000000e+00> : vector<128xf32>
    %15 = vector.multi_reduction <add>, %14, %cst_6 [0] : vector<8x128xf32> to vector<128xf32>
    %16 = vector.shape_cast %15 : vector<128xf32> to vector<1x128xf32>
    %cst_7 = arith.constant dense<0.000000e+00> : vector<1xf32>
    %17 = vector.multi_reduction <add>, %16, %cst_7 [1] : vector<1x128xf32> to vector<1xf32>
    %18 = vector.shape_cast %17 : vector<1xf32> to vector<1x1xf32>
    %cst_8 = arith.constant 9.765625E-4 : f32
    %19 = vector.broadcast %cst_8 : f32 to vector<1x1xf32>
    %20 = arith.mulf %18, %19 : vector<1x1xf32>
    %cst_9 = arith.constant 9.99999974E-6 : f32
    %21 = vector.broadcast %cst_9 : f32 to vector<1x1xf32>
    %22 = arith.addf %20, %21 : vector<1x1xf32>
    %23 = math.rsqrt %22 : vector<1x1xf32>
    %c0_10 = arith.constant 0 : index
    %c0_11 = arith.constant 0 : index
    %24 = vector.load %arg2[%c0_10, %c0_11] : memref<8x128xf32, #tpu.memory_space<vmem>>, vector<8x128xf32>
    %c0_12 = arith.constant 0 : index
    %c0_13 = arith.constant 0 : index
    %25 = vector.load %arg3[%c0_12, %c0_13] : memref<8x128xf32, #tpu.memory_space<vmem>>, vector<8x128xf32>
    %26 = vector.broadcast %23 : vector<1x1xf32> to vector<8x128xf32>
    %27 = arith.mulf %11, %26 : vector<8x128xf32>
    %28 = arith.mulf %27, %24 : vector<8x128xf32>
    %29 = arith.addf %28, %25 : vector<8x128xf32>
    %c0_14 = arith.constant 0 : index
    %c0_15 = arith.constant 0 : index
    %c0_16 = arith.constant 0 : index
    %30 = vector.load %arg4[%c0_14, %c0_15, %c0_16] : memref<1x8x128xf32, #tpu.memory_space<vmem>>, vector<1x8x128xf32>
    %31 = vector.shape_cast %30 : vector<1x8x128xf32> to vector<8x128xf32>
    %32 = vector.shape_cast %29 : vector<8x128xf32> to vector<1x8x128xf32>
    tpu.vector_store %arg4[%c0_14, %c0_15, %c0_16], %32 {strides = array<i32>} : memref<1x8x128xf32, #tpu.memory_space<vmem>>, vector<1x8x128xf32>,
    return
  }
  func.func @transform_0(%arg0: i32) -> (i32, i32, i32) {
    %c0_i32 = arith.constant 0 : i32
    %c0_i32_0 = arith.constant 0 : i32
    %c0_i32_1 = arith.constant 0 : i32
    return %arg0, %c0_i32, %c0_i32_0 : i32, i32, i32
  }
  func.func @transform_1(%arg0: i32) -> (i32, i32) {
    %c0_i32 = arith.constant 0 : i32
    %c0_i32_0 = arith.constant 0 : i32
    %c0_i32_1 = arith.constant 0 : i32
    return %c0_i32, %c0_i32_0 : i32, i32
  }
  func.func @transform_2(%arg0: i32) -> (i32, i32) {
    %c0_i32 = arith.constant 0 : i32
    %c0_i32_0 = arith.constant 0 : i32
    %c0_i32_1 = arith.constant 0 : i32
    return %c0_i32, %c0_i32_0 : i32, i32
  }
  func.func @transform_3(%arg0: i32) -> (i32, i32, i32) {
    %c0_i32 = arith.constant 0 : i32
    %c0_i32_0 = arith.constant 0 : i32
    %c0_i32_1 = arith.constant 0 : i32
    return %arg0, %c0_i32, %c0_i32_0 : i32, i32, i32
  }
}

</mosaic_0001>

<bundles_post_ra>
// kernel: tpu_custom_call.1
= control target key start
LH: loop header
LB: loop body
LE: loop exit
PB: predicated region body
PF: predicated region fallthrough
CT: control target
= control target key end

     0   :  { %8 = vsyncpa [#allocation3], 0  ;;  %s841_s0 = inlined_call_operand.hbm [shape: f32[2,8,128], index: 0, kind: input, shape index: {}]   ;;  %s842_s1 = inlined_call_operand.hbm [shape: f32[8,128], index: 1, kind: input, shape index: {}]   ;;  %s843_s2 = inlined_call_operand.hbm [shape: f32[8,128], index: 2, kind: input, shape index: {}]   ;;  %s844_s3 = inlined_call_operand.hbm [shape: f32[2,8,128], index: 3, kind: output, shape index: {}]  }
   0x1   :  { %10 = vsyncpa [#allocation3 + $0x1], 0 }
   0x2   :  { %11 = vsyncpa [#allocation6], 0 }
   0x3   :  { %12 = vsyncpa [#allocation4], 0 }
   0x4   :  { %14 = vsyncpa [#allocation4 + $0x1], 0  ;;  %s612_s12 = smov 0   ;;  %s614_s13 = smov 0  }
   0x5   :  { %s616_s14 = smov 0   ;;  %s618_s15 = smov 0  }
   0x6 LB: > { %s633_s16 = sadd.s32 4294967295, %s586_s15   ;;  %s345_s17 = sadd.s32 4294967294, %s586_s15   ;;  %s586_s15 = sphi %s618_s15, %s864_s15   ;;  %s582_s14 = sphi %s616_s14, %s863_s14   ;;  %s578_s13 = sphi %s614_s13, %s862_s13   ;;  %s574_s12 = sphi %s612_s12, %s861_s12  }
   0x7   : > { %p40_p0 = scmp.ne.s32.totalorder %s578_s13, %s574_s12  ;;  %p845_p1 = scmp.eq.s32.totalorder %s633_s16, 0 }
   0x8   : > { %p112_p3 = scmp.eq.s32.totalorder %s345_s17, 1  ;;  %p346_p5 = scmp.ge.s32.totalorder %s586_s15, 1 }
   0x9   : > { %p642_p4 = por %p845_p1, %p40_p0  ;;  %p119_p7 = scmp.lt.s32.totalorder %s586_s15, 3 }
   0xa   : > { %p647_p6 = por %p112_p3, %p40_p0  ;;  %s588_s21 = smov [#allocation5]  }
   0xb   : > { %s848_s18 = scalar_select %p642_p4, 1, 0 }
   0xc   : > { %s849_s19 = scalar_select %p647_p6, 1, 0 }
   0xd   : > { %p652_p8 = pnand %p346_p5, %p119_p7  ;;  %s132_s22 = sshll.u32 %s588_s21, 4  ;;  %s133_s22 = int_to_ptr.vmem [resolvable:$true] %s132_s22 }
   0xe   : > { %s589_s23 = smov [#allocation7]   ;;  %s668_s26 = sadd.s32 1, %s586_s15  }
   0xf   : > { %s850_s20 = scalar_select %p652_p8, 1, 0 }
  0x10   : > { %p373_p10 = pneg %p652_p8  ;;  %s143_s24 = sshll.u32 %s589_s23, 4  ;;  %s665_s24 = int_to_ptr.vmem [resolvable:$true] %s143_s24 }
  0x11   : > { %s24_s27 = ssub.s32 %s586_s15, %s668_s26  ;;  %s430_s30 = scalar_lea.hbm %s842_s1, 128 }
  0x12   : > { %p661_p11 = pnand %p373_p10, %p845_p1  ;;  %p431_p12 = scmp.ne.s32.totalorder %s842_s1, %s430_s30 }
  0x13   : > { %p437_p5 = scmp.lt.u32.totalorder %s430_s30, %s842_s1 }
  0x14   : > { %p432_p13 = pneg %p661_p11 }
  0x16   : > { %p433_p0 = pnand %p432_p13, %p431_p12 }
  0x18   : > { %p434_p3 = pneg %p433_p0 }
  0x1a   : > { %p439_p7 = pnand %p437_p5, %p434_p3 }
  0x1c   : > { %442 = shalt.err (!%p439_p7)
}
  0x1d   : > { %s443_s8 = scalar_lea.vmem %s133_s22, 128  ;;  %p451_p2 = scmp.lt.s32.totalorder %s133_s22, %s133_s22 }
  0x1e   : > { %p444_p10 = scmp.ne.s32.totalorder %s133_s22, %s443_s8  ;;  %p452_p6 = scmp.lt.s32.totalorder %s443_s8, %s443_s8 }
  0x20   : > { %p446_p9 = pnand %p444_p10, %p432_p13  ;;  %p453_p4 = por %p452_p6, %p451_p2 }
  0x22   : > { %p447_p1 = pneg %p446_p9 }
  0x24   : > { %p454_p8 = pnand %p453_p4, %p447_p1 }
  0x26   : > { %457 = shalt.err (!%p454_p8)
}
  0x27   : > { %376 = dma.hbm_to_vmem [thread:$0]  (!%p661_p11), %s842_s1, 128, %s133_s22, [#allocation6]  }
  0x28   : > { %s458_s21 = scalar_lea.hbm %s843_s2, 128 }
  0x29   : > { %p459_p9 = scmp.ne.s32.totalorder %s843_s2, %s458_s21  ;;  %p465_p4 = scmp.lt.u32.totalorder %s458_s21, %s843_s2 }
  0x2b   : > { %p461_p2 = pnand %p459_p9, %p432_p13 }
  0x2d   : > { %p462_p1 = pneg %p461_p2 }
  0x2f   : > { %p467_p6 = pnand %p465_p4, %p462_p1 }
  0x31   : > { %470 = shalt.err (!%p467_p6)
}
  0x32   : > { %s471_s22 = scalar_lea.vmem %s665_s24, 128  ;;  %p479_p3 = scmp.lt.s32.totalorder %s665_s24, %s665_s24 }
  0x33   : > { %p472_p8 = scmp.ne.s32.totalorder %s665_s24, %s471_s22  ;;  %p480_p5 = scmp.lt.s32.totalorder %s471_s22, %s471_s22 }
  0x35   : > { %p474_p12 = pnand %p472_p8, %p432_p13  ;;  %p481_p7 = por %p480_p5, %p479_p3 }
  0x37   : > { %p475_p0 = pneg %p474_p12 }
  0x39   : > { %p482_p10 = pnand %p481_p7, %p475_p0 }
  0x3b   : > { %485 = shalt.err (!%p482_p10)
}
  0x3c   : > { %379 = dma.hbm_to_vmem [thread:$0]  (!%p661_p11), %s843_s2, 128, %s665_s24, [#allocation6]  }
  0x3d   : > { %p25_p13 = scmp.eq.s32.totalorder %s24_s27, 0  ;;  %s27_s6 = sadd.s32 1, %s582_s14 }
  0x3e   : > { %p34_p9 = scmp.ne.s32.totalorder %s582_s14, %s578_s13  ;;  %p35_p2 = scmp.eq.s32.totalorder %s586_s15, 0 }
  0x3f   : > { %s727_s25 = scalar_select %p25_p13, %s582_s14, %s27_s6  }
  0x40   : > { %p36_p1 = por %p35_p2, %p34_p9  ;;  %p852_p4 = scmp.eq.s32.totalorder %s633_s16, 1 }
  0x41   : > { %p390_p8 = scmp.lt.s32.totalorder %s586_s15, 2  ;;  %s154_s8 = sand.u32 1, %s582_s14  }
  0x42   : > { %p731_p6 = por %p852_p4, %p34_p9  ;;  %s350_s9 = sshll.u32 %s154_s8, 3 }
  0x43   : > { %s351_s10 = sshll.u32 %s586_s15, 7  ;;  %s158_s27 = scalar_lea.vmem [#allocation2], %s350_s9 }
  0x44   : > { %s741_s24 = scalar_lea.hbm %s841_s0, %s351_s10  ;;  %s165_s21 = sshll.u32 %s158_s27, 4  ;;  %s743_s21 = int_to_ptr.vmem [resolvable:$true] %s165_s21 }
  0x45   : > { %p745_p11 = pnand %p390_p8, %p36_p1  ;;  %s155_s28 = scalar_lea.sflag [#allocation3], %s154_s8 }
  0x46   : > { %s486_s29 = scalar_lea.hbm %s741_s24, 128  ;;  %s491_s4 = scalar_lea.hbm %s841_s0, 256 }
  0x47   : > { %p487_p12 = scmp.ne.s32.totalorder %s741_s24, %s486_s29  ;;  %p488_p0 = pneg %p745_p11 }
  0x48   : > { %p492_p7 = scmp.lt.u32.totalorder %s741_s24, %s841_s0  ;;  %p493_p10 = scmp.lt.u32.totalorder %s491_s4, %s486_s29 }
  0x49   : > { %p489_p3 = pnand %p488_p0, %p487_p12  ;;  %p495_p9 = scmp.lt.u32.totalorder %s486_s29, %s741_s24 }
  0x4a   : > { %p494_p13 = por %p493_p10, %p492_p7 }
  0x4b   : > { %p490_p5 = pneg %p489_p3 }
  0x4c   : > { %p496_p2 = por %p495_p9, %p494_p13 }
  0x4e   : > { %p497_p1 = pnand %p496_p2, %p490_p5 }
  0x50   : > { %500 = shalt.err (!%p497_p1)
}
  0x51   : > { %s501_s8 = scalar_lea.vmem %s743_s21, 128  ;;  %s590_s9 = smov [#allocation2]  }
  0x52   : > { %p502_p4 = scmp.ne.s32.totalorder %s743_s21, %s501_s8  ;;  %s506_s10 = sshll.u32 %s590_s9, 4  ;;  %s507_s10 = int_to_ptr.vmem [resolvable:$false] %s506_s10 }
  0x53   : > { %s508_s11 = scalar_lea.vmem %s507_s10, 256  ;;  %p509_p3 = scmp.lt.s32.totalorder %s743_s21, %s507_s10 }
  0x54   : > { %p504_p8 = pnand %p502_p4, %p488_p0  ;;  %p510_p7 = scmp.lt.s32.totalorder %s508_s11, %s501_s8 }
  0x56   : > { %p505_p12 = pneg %p504_p8  ;;  %p511_p10 = por %p510_p7, %p509_p3 }
  0x58   : > { %p512_p13 = pnand %p511_p10, %p505_p12 }
  0x5a   : > { %515 = shalt.err (!%p512_p13)
}
  0x5b   : > { %383 = dma.hbm_to_vmem [thread:$0]  (!%p745_p11), %s741_s24, 128, %s743_s21, %s155_s28  }
  0x5c   : > { %p855_p5 = scmp.ne.s32.totalorder %s850_s20, 0 }
  0x5d   : > { %s777_s17 = sand.u32 (!%p855_p5), 1, %s578_s13   ;;  %p856_p0 = scmp.ne.s32.totalorder (!%p855_p5), %s848_s18, 0 }
  0x5e   : > { %174 = sbr.rel (%p855_p5) target bundleno = 455 (0x1c7), region = 32  ;;  %s353_s27 = sshll.u32 (!%p855_p5), %s777_s17, 3 }
  0x5f   : > { %s177_s29 = scalar_lea.sflag (!%p855_p5), [#allocation3], %s777_s17  ;;  %s180_s30 = scalar_lea.vmem (!%p855_p5), [#allocation2], %s353_s27 }
  0x65   : > { %561 = dma.done.wait (%p856_p0), %s177_s29, 128  }
  0x66   : > { %563 = vsyncadd (%p856_p0), %s177_s29, 4294967168  ;;  %p857_p11 = scmp.eq.s32.totalorder %s633_s16, 0 }
  0x68   : > { %565 = dma.done.wait (%p857_p11), [#allocation6], 256   ;;  %p858_p9 = pmov %p857_p11 }
  0x69   : > { %v211_v0 = vld [vmem:[%s180_s30] sm:$0xff]  ;;  %v236_v21 = vld [vmem:[#allocation5] sm:$0xff]  ;;  %v237_v23 = vld [vmem:[#allocation7] sm:$0xff]  ;;  %s358_s18 = sshll.u32 %s633_s16, 7  ;;  %s210_s20 = scalar_lea.vmem [#allocation8], %s353_s27 }
  0x6a   : > { %567 = vsyncadd (%p858_p9), [#allocation6], 4294967040  ;;  %v213_v1 = vrot.slane %v211_v0, 4  ;;  %s256_s24 = sshll.u32 %s210_s20, 4  ;;  %s797_s28 = scalar_lea.hbm %s844_s3, %s358_s18  ;;  %s799_s24 = int_to_ptr.vmem [resolvable:$true] %s256_s24 }
  0x6b   : > { %s243_s22 = scalar_lea.sflag [#allocation4], %s777_s17  ;;  %s516_s4 = scalar_lea.vmem %s799_s24, 128 }
  0x6c   : > { %v214_v2 = vadd.f32 %v213_v1, %v211_v0  ;;  %p517_p2 = scmp.ne.s32.totalorder %s799_s24, %s516_s4  ;;  %s591_s16 = smov [#allocation8]  }
  0x6d   : > { %s520_s5 = sshll.u32 %s591_s16, 4  ;;  %s521_s5 = int_to_ptr.vmem [resolvable:$false] %s520_s5 }
  0x6e   : > { %v215_v3 = vrot.slane %v214_v2, 2  ;;  %p518_p1 = pnand %p517_p2, %p731_p6  ;;  %s522_s6 = scalar_lea.vmem %s521_s5, 256 }
  0x6f   : > { %p523_p8 = scmp.lt.s32.totalorder %s799_s24, %s521_s5  ;;  %p524_p12 = scmp.lt.s32.totalorder %s522_s6, %s516_s4 }
  0x70   : > { %v216_v4 = vadd.f32 %v215_v3, %v214_v2  ;;  %p519_p4 = pneg %p518_p1 }
  0x71   : > { %p525_p3 = por %p524_p12, %p523_p8 }
  0x72   : > { %v217_v5 = vrot.slane %v216_v4, 1 }
  0x73   : > { %p526_p7 = pnand %p525_p3, %p519_p4 }
  0x74   : > { %v218_v6 = vadd.f32 %v217_v5, %v216_v4 }
  0x76   : > { %219 = vadd.xlane.f32.xlu0 %v218_v6 }
 0x103   : > { %v220_v7 = vpop.xlane.xlu0 %219 }
 0x104   : > { %v221_v8 = vmul.f32 0.0009765625, %v220_v7 }
 0x106   : > { %v222_v9 = vsub.f32 %v211_v0, %v221_v8 }
 0x108   : > { %v223_v10 = vmul.f32 %v222_v9, %v222_v9 }
 0x10a   : > { %v225_v11 = vrot.slane %v223_v10, 4 }
 0x10c   : > { %v226_v12 = vadd.f32 %v225_v11, %v223_v10 }
 0x10e   : > { %v227_v13 = vrot.slane %v226_v12, 2 }
 0x110   : > { %v228_v14 = vadd.f32 %v227_v13, %v226_v12 }
 0x112   : > { %v229_v15 = vrot.slane %v228_v14, 1 }
 0x114   : > { %v230_v16 = vadd.f32 %v229_v15, %v228_v14 }
 0x116   : > { %231 = vadd.xlane.f32.xlu0 %v230_v16 }
 0x1a3   : > { %v232_v17 = vpop.xlane.xlu0 %231 }
 0x1a4   : > { %v233_v18 = vmul.f32 0.0009765625, %v232_v17 }
 0x1a6   : > { %v234_v19 = vadd.f32 1e-05, %v233_v18 }
 0x1a8   : > { %428 = vrsqrt.f32 %v234_v19 }
 0x1b2   : > { %v429_v20 = vpop.eup %428 }
 0x1b3   : > { %v238_v22 = vmul.f32 %v429_v20, %v222_v9 }
 0x1b5   : > { %v239_v24 = vmul.f32 %v238_v22, %v236_v21 }
 0x1b7   : > { %v240_v25 = vadd.f32 %v239_v24, %v237_v23 }
 0x1b9   : > { %241 = vst [vmem:[%s210_s20] sm:$0xff] %v240_v25 }
 0x1ba   : > { %529 = shalt.err (!%p526_p7)
}
 0x1bb   : > { %s530_s8 = scalar_lea.hbm %s797_s28, 128  ;;  %s534_s11 = scalar_lea.hbm %s844_s3, 256 }
 0x1bc   : > { %p531_p10 = scmp.ne.s32.totalorder %s797_s28, %s530_s8  ;;  %p535_p0 = scmp.lt.u32.totalorder %s797_s28, %s844_s3 }
 0x1bd   : > { %p536_p11 = scmp.lt.u32.totalorder %s534_s11, %s530_s8  ;;  %p538_p2 = scmp.lt.u32.totalorder %s530_s8, %s797_s28 }
 0x1be   : > { %p532_p13 = pnand %p531_p10, %p731_p6 }
 0x1bf   : > { %p537_p9 = por %p536_p11, %p535_p0 }
 0x1c0   : > { %p533_p5 = pneg %p532_p13 }
 0x1c1   : > { %p539_p1 = por %p538_p2, %p537_p9 }
 0x1c3   : > { %p540_p4 = pnand %p539_p1, %p533_p5 }
 0x1c5   : > { %543 = shalt.err (!%p540_p4)
}
 0x1c6   : > { %371 = dma.vmem_to_hbm [thread:$0]  (%p731_p6), %s799_s24, 128, %s797_s28, %s243_s22  }
 0x1c7 PF: > { %s268_s29 = sand.u32 1, %s574_s12   ;;  %p859_p8 = scmp.ne.s32.totalorder %s849_s19, 0 }
 0x1c8   : > { %p860_p12 = scmp.ge.s32.totalorder %s586_s15, 2  ;;  %s269_s30 = scalar_lea.sflag [#allocation4], %s268_s29 }
 0x1ca   : > { %p385_p3 = pnand %p860_p12, %p859_p8 }
 0x1cc   : > { %569 = dma.done.wait (!%p385_p3), %s269_s30, 128  }
 0x1cd   : > { %571 = vsyncadd (!%p385_p3), %s269_s30, 4294967168  ;;  %p17_p7 = scmp.ge.s32.totalorder %s668_s26, 4   ;;  %s861_s12 = smov %s578_s13 }
 0x1ce   : > { %s862_s13 = smov %s582_s14  ;;  %s863_s14 = smov %s727_s25 }
 0x1cf   : > { %s864_s15 = smov %s668_s26  ;;  %19 = sbr.rel (!%p17_p7) target bundleno = 6 (0x6), region = 85 }
 0x1d6   :  { %274 = vsyncpa [#allocation3], 1 }
 0x1d7   :  { %276 = vsyncpa [#allocation3 + $0x1], 1 }
 0x1d8   :  { %277 = vsyncpa [#allocation6], 1 }
 0x1d9   :  { %278 = vsyncpa [#allocation4], 1 }
 0x1da   :  { %280 = vsyncpa [#allocation4 + $0x1], 1 }

</bundles_post_ra>
